<compile_context>
chip_gen: v5e
topology: v5e:2x2
jax: 0.10.0
libtpu: 0.0.40
codegen_flags: <defaults>
</compile_context>

<pallas_src>
import jax
import jax.numpy as jnp
import numpy as np
from jax.experimental import pallas as pl
from jax.experimental.pallas import tpu as pltpu


def _make_semidiv_kernel(C: int):
    """Kernel over one (1, C, TS) input block and (1, P, TS) output block."""

    def kernel(x_ref, o_ref):
        x = x_ref[0].astype(jnp.float32)          # (C, TS); no-op cast for f32
        inv = 1.0 / x                             # C exact reciprocals (EUP)
        off = 0
        for i in range(C):                        # static loop, C is small
            n = C - i
            # rows [off, off+n) = x[i] / x[j], j = i..C-1  ==  x[i] * inv[i:]
            block = x[i:i + 1, :] * inv[i:, :]    # (1,TS) bcast * (n,TS) -> VPU
            o_ref[0, off:off + n, :] = block.astype(o_ref.dtype)
            off += n

    return kernel


def _ceil_to(v: int, m: int) -> int:
    return ((v + m - 1) // m) * m


def semidiv_pallas(x: jax.Array, in_dim: int | None = None, *,
                   max_tile_lanes: int = 8192,
                   vmem_budget_bytes: int = 12 * (1 << 20)) -> jax.Array:
    if in_dim is None:
        in_dim = x.shape[1]
    assert x.shape[1] == in_dim, "channel dim of x must equal in_dim"

    B, C = x.shape[0], x.shape[1]
    spatial = x.shape[2:]
    S = int(np.prod(spatial)) if spatial else 1
    P = C * (C + 1) // 2
    itemsize = jnp.dtype(x.dtype).itemsize

    x3 = x.reshape(B, C, S)

    # Small spatial extent: fold batch into the lane axis so stores stay
    # lane-dense (avoids masked vst.msk partial stores).
    fold_batch = (S < 128 and B > 1)
    if fold_batch:
        x3 = jnp.transpose(x3, (1, 0, 2)).reshape(1, C, B * S)
        B_eff, S_eff = 1, B * S
    else:
        B_eff, S_eff = B, S

    # --- Tile-size selection: budget-aware, lane-dense -----------------------
    # Per-lane VMEM bytes: double-buffered input + output blocks plus the f32
    # temporaries (inv and the broadcast product) the kernel materializes.
    bytes_per_lane = 2 * (C + P) * itemsize + 2 * C * 4
    ts_budget = max(128, (vmem_budget_bytes // bytes_per_lane) // 128 * 128)
    ts_cap = min(max_tile_lanes, ts_budget)

    S_pad = _ceil_to(S_eff, 128)

    if S_pad <= ts_cap:
        TS = S_pad                                   # single spatial tile
    else:
        # Largest 128-multiple divisor of S_pad within the cap.
        TS = 128
        for cand in range(ts_cap, 127, -128):
            if S_pad % cand == 0:
                TS = cand
                break
        if TS < 512:
            # Awkward divisor: pad up instead (pad value 1.0 is denominator
            # safe) to keep >=512 lanes per tile (HBM-roofline sweet spot).
            TS = min(ts_cap, 1024)
            S_pad = _ceil_to(S_pad, TS)

    # Guarantee >=2 grid points where possible so both v7x TensorCores get work.
    if B_eff * (S_pad // TS) < 2 and S_pad >= 256:
        TS = _ceil_to(S_pad // 2, 128)
        S_pad = 2 * TS

    if S_pad != S_eff:
        x3 = jnp.pad(x3, ((0, 0), (0, 0), (0, S_pad - S_eff)),
                     constant_values=1.0)            # denominator-safe pad

    grid = (B_eff, S_pad // TS)

    cost = pl.CostEstimate(
        flops=B * P * S,                             # one multiply per output
        transcendentals=B * C * S,                   # one reciprocal per input
        bytes_accessed=(B * C * S + B * P * S) * itemsize,
    )

    out = pl.pallas_call(
        _make_semidiv_kernel(C),
        out_shape=jax.ShapeDtypeStruct((B_eff, P, S_pad), x.dtype),
        grid=grid,
        in_specs=[pl.BlockSpec((1, C, TS), lambda b, s: (b, 0, s))],
        out_specs=pl.BlockSpec((1, P, TS), lambda b, s: (b, 0, s)),
        compiler_params=pltpu.CompilerParams(
            dimension_semantics=("parallel", "parallel")),
        cost_estimate=cost,
    )(x3)

    out = out[:, :, :S_eff]
    if fold_batch:
        out = out.reshape(P, B, S).transpose(1, 0, 2)
    return out.reshape((B, P) + spatial)


class SemiDivPallas:
    """Mirror of the PyTorch SemiDiv module (no parameters)."""

    def __init__(self, in_dim: int, threshold: float = 1e-10):
        # `threshold` kept for parity with the PyTorch module; like the
        # reference forward(), it is not used in the computation.
        self.threshold = threshold
        self.in_dim = in_dim
        self.out_dim = in_dim * (in_dim + 1) // 2
        self.is_unary = False
        self.is_directed = False

    def __call__(self, x: jax.Array) -> jax.Array:
        return semidiv_pallas(x, in_dim=self.in_dim)


if __name__ == "__main__":
    key = jax.random.PRNGKey(0)
    B, C, H, W = 2, 4, 16, 16
    x = jax.random.normal(key, (B, C, H, W), dtype=jnp.float32)

    mod = SemiDivPallas(in_dim=C)
    y = mod(x)
    jax.block_until_ready(y)

    # Pure-JAX reference: x[:, triu_rows] / x[:, triu_cols] (torch order).
    rows, cols = np.triu_indices(C)
    y_ref = x[:, rows, :, :] / x[:, cols, :, :]

    assert y.shape == (B, C * (C + 1) // 2, H, W)
    assert y.dtype == x.dtype
    # Kernel computes a * (1/b) with the exact reciprocal; ~1-2 ulp vs a / b.
    assert bool(jnp.allclose(y, y_ref, rtol=1e-5, atol=1e-6))
    print("KERNEL_OK")
</pallas_src>

<mosaic_0001>
module attributes {stable_mosaic.version = 11 : i64} {
  func.func @kernel(%arg0: i32, %arg1: i32, %arg2: memref<1x4x256xf32, #tpu.memory_space<vmem>>, %arg3: memref<1x10x256xf32, #tpu.memory_space<vmem>>) attributes {dimension_semantics = [#tpu.dimension_semantics<parallel>, #tpu.dimension_semantics<parallel>], iteration_bounds = array<i64: 2, 1>, scalar_prefetch = 0 : i64, scratch_operands = 0 : i64, tpu.core_type = #tpu.core_type<tc>, window_params = [{transform_indices = @transform_0, window_bounds = array<i64: 1, 4, 256>}, {transform_indices = @transform_1, window_bounds = array<i64: 1, 10, 256>}]} {
    %c0 = arith.constant 0 : index
    %c0_0 = arith.constant 0 : index
    %c0_1 = arith.constant 0 : index
    %0 = vector.load %arg2[%c0, %c0_0, %c0_1] : memref<1x4x256xf32, #tpu.memory_space<vmem>>, vector<1x4x256xf32>
    %1 = vector.shape_cast %0 : vector<1x4x256xf32> to vector<4x256xf32>
    %cst = arith.constant 1.000000e+00 : f32
    %2 = vector.broadcast %cst : f32 to vector<4x256xf32>
    %3 = arith.divf %2, %1 : vector<4x256xf32>
    %4 = vector.extract_strided_slice %1 {offsets = [0, 0], sizes = [1, 256], strides = [1, 1]} : vector<4x256xf32> to vector<1x256xf32>
    %5 = vector.broadcast %4 : vector<1x256xf32> to vector<4x256xf32>
    %6 = arith.mulf %5, %3 : vector<4x256xf32>
    %c0_2 = arith.constant 0 : index
    %c0_3 = arith.constant 0 : index
    %c0_4 = arith.constant 0 : index
    %7 = vector.load %arg3[%c0_2, %c0_3, %c0_4] : memref<1x10x256xf32, #tpu.memory_space<vmem>>, vector<1x4x256xf32>
    %8 = vector.shape_cast %7 : vector<1x4x256xf32> to vector<4x256xf32>
    %9 = vector.shape_cast %6 : vector<4x256xf32> to vector<1x4x256xf32>
    tpu.vector_store %arg3[%c0_2, %c0_3, %c0_4], %9 {strides = array<i32>} : memref<1x10x256xf32, #tpu.memory_space<vmem>>, vector<1x4x256xf32>,
    %10 = vector.extract_strided_slice %1 {offsets = [1, 0], sizes = [1, 256], strides = [1, 1]} : vector<4x256xf32> to vector<1x256xf32>
    %11 = vector.extract_strided_slice %3 {offsets = [1, 0], sizes = [3, 256], strides = [1, 1]} : vector<4x256xf32> to vector<3x256xf32>
    %12 = vector.broadcast %10 : vector<1x256xf32> to vector<3x256xf32>
    %13 = arith.mulf %12, %11 : vector<3x256xf32>
    %c0_5 = arith.constant 0 : index
    %c4 = arith.constant 4 : index
    %c0_6 = arith.constant 0 : index
    %14 = vector.load %arg3[%c0_5, %c4, %c0_6] : memref<1x10x256xf32, #tpu.memory_space<vmem>>, vector<1x3x256xf32>
    %15 = vector.shape_cast %14 : vector<1x3x256xf32> to vector<3x256xf32>
    %16 = vector.shape_cast %13 : vector<3x256xf32> to vector<1x3x256xf32>
    tpu.vector_store %arg3[%c0_5, %c4, %c0_6], %16 {strides = array<i32>} : memref<1x10x256xf32, #tpu.memory_space<vmem>>, vector<1x3x256xf32>,
    %17 = vector.extract_strided_slice %1 {offsets = [2, 0], sizes = [1, 256], strides = [1, 1]} : vector<4x256xf32> to vector<1x256xf32>
    %18 = vector.extract_strided_slice %3 {offsets = [2, 0], sizes = [2, 256], strides = [1, 1]} : vector<4x256xf32> to vector<2x256xf32>
    %19 = vector.broadcast %17 : vector<1x256xf32> to vector<2x256xf32>
    %20 = arith.mulf %19, %18 : vector<2x256xf32>
    %c0_7 = arith.constant 0 : index
    %c7 = arith.constant 7 : index
    %c0_8 = arith.constant 0 : index
    %21 = vector.load %arg3[%c0_7, %c7, %c0_8] : memref<1x10x256xf32, #tpu.memory_space<vmem>>, vector<1x2x256xf32>
    %22 = vector.shape_cast %21 : vector<1x2x256xf32> to vector<2x256xf32>
    %23 = vector.shape_cast %20 : vector<2x256xf32> to vector<1x2x256xf32>
    tpu.vector_store %arg3[%c0_7, %c7, %c0_8], %23 {strides = array<i32>} : memref<1x10x256xf32, #tpu.memory_space<vmem>>, vector<1x2x256xf32>,
    %24 = vector.extract_strided_slice %1 {offsets = [3, 0], sizes = [1, 256], strides = [1, 1]} : vector<4x256xf32> to vector<1x256xf32>
    %25 = vector.extract_strided_slice %3 {offsets = [3, 0], sizes = [1, 256], strides = [1, 1]} : vector<4x256xf32> to vector<1x256xf32>
    %26 = arith.mulf %24, %25 : vector<1x256xf32>
    %c0_9 = arith.constant 0 : index
    %c9 = arith.constant 9 : index
    %c0_10 = arith.constant 0 : index
    %27 = vector.load %arg3[%c0_9, %c9, %c0_10] : memref<1x10x256xf32, #tpu.memory_space<vmem>>, vector<1x1x256xf32>
    %28 = vector.shape_cast %27 : vector<1x1x256xf32> to vector<1x256xf32>
    %29 = vector.shape_cast %26 : vector<1x256xf32> to vector<1x1x256xf32>
    tpu.vector_store %arg3[%c0_9, %c9, %c0_10], %29 {strides = array<i32>} : memref<1x10x256xf32, #tpu.memory_space<vmem>>, vector<1x1x256xf32>,
    return
  }
  func.func @transform_0(%arg0: i32, %arg1: i32) -> (i32, i32, i32) {
    %c0_i32 = arith.constant 0 : i32
    %c0_i32_0 = arith.constant 0 : i32
    return %arg0, %c0_i32, %arg1 : i32, i32, i32
  }
  func.func @transform_1(%arg0: i32, %arg1: i32) -> (i32, i32, i32) {
    %c0_i32 = arith.constant 0 : i32
    %c0_i32_0 = arith.constant 0 : i32
    return %arg0, %c0_i32, %arg1 : i32, i32, i32
  }
}

</mosaic_0001>

<bundles_post_ra>
// kernel: tpu_custom_call.1
= control target key start
LH: loop header
LB: loop body
LE: loop exit
PB: predicated region body
PF: predicated region fallthrough
CT: control target
= control target key end

     0   :  { %6 = vsyncpa [#allocation3], 0  ;;  %s618_s0 = inlined_call_operand.hbm [shape: f32[2,4,256], index: 0, kind: input, shape index: {}]   ;;  %s619_s1 = inlined_call_operand.vmem [shape: f32[2,10,256], index: 1, kind: output, shape index: {}]  }
   0x1   :  { %8 = vsyncpa [#allocation3 + $0x1], 0  ;;  %s519_s6 = smov 0   ;;  %s521_s7 = smov 0  }
   0x2   :  { %s523_s8 = smov 0   ;;  %s525_s9 = smov 0  }
   0x3   :  { %s527_s10 = smov 0   ;;  %s529_s11 = smov 0  }
   0x4 LB: > { %s354_s12 = sadd.s32 4294967295, %s507_s11   ;;  %s26_s13 = sadd.s32 1, %s503_s10  ;;  %s507_s11 = sphi %s529_s11, %s14_s11   ;;  %s503_s10 = sphi %s527_s10, %s626_s10   ;;  %s499_s9 = sphi %s525_s9, %s625_s9   ;;  %s495_s8 = sphi %s523_s8, %s624_s8   ;;  %s491_s7 = sphi %s521_s7, %s623_s7   ;;  %s487_s6 = sphi %s519_s6, %s622_s6  }
   0x5   : > { %p28_p0 = scmp.ge.s32.totalorder %s26_s13, 2  ;;  %s35_s14 = sadd.s32 1, %s495_s8 }
   0x6   : > { %p42_p1 = scmp.ne.s32.totalorder %s495_s8, %s491_s7  ;;  %p43_p2 = scmp.eq.s32.totalorder %s507_s11, 0 }
   0x7   : > { %s628_s13 = smov (%p28_p0, %s26_s13), 0  ;;  %p48_p4 = scmp.ne.s32.totalorder %s491_s7, %s487_s6 }
   0x8   : > { %p555_p3 = por %p43_p2, %p42_p1  ;;  %s30_s16 = ssub.s32 %s503_s10, %s628_s13 }
   0x9   : > { %p49_p5 = scmp.eq.s32.totalorder %s354_s12, 0  ;;  %p33_p6 = scmp.eq.s32.totalorder %s30_s16, 0 }
   0xa   : > { %p376_p8 = scmp.lt.s32.totalorder %s507_s11, 2  ;;  %s100_s19 = sand.u32 1, %s495_s8  }
   0xb   : > { %p562_p7 = por %p49_p5, %p48_p4  ;;  %s368_s20 = sshll.u32 %s503_s10, 3 }
   0xc   : > { %s568_s18 = scalar_select %p33_p6, %s495_s8, %s35_s14  }
   0xd   : > { %s358_s21 = sshll.u32 %s100_s19, 3  ;;  %s111_s24 = scalar_lea.hbm %s618_s0, %s368_s20 }
   0xe   : > { %s113_s25 = sshll.u32 %s111_s24, 4  ;;  %s104_s26 = scalar_lea.vmem [#allocation2], %s358_s21  ;;  %s114_s25 = int_to_ptr.hbm [resolvable:$true] %s113_s25 }
   0xf   : > { %s115_s27 = sshll.u32 %s104_s26, 4  ;;  %p373_p9 = pnand %p376_p8, %p555_p3  ;;  %s116_s27 = int_to_ptr.vmem [resolvable:$true] %s115_s27 }
  0x10   : > { %p361_p10 = scmp.ge.s32.totalorder %s507_s11, 1  ;;  %p120_p11 = scmp.lt.s32.totalorder %s507_s11, 3 }
  0x11   : > { %s101_s28 = scalar_lea.sflag [#allocation3], %s100_s19 }
  0x12   : > { %375 = dma.hbm_to_vmem [thread:$0]  (!%p373_p9), %s114_s25, 128, %s116_s27, %s101_s28  }
  0x13   : > { %p121_p12 = pnand %p361_p10, %p120_p11 }
  0x14   : > { %s126_s29 = sand.u32 (!%p121_p12), 1, %s491_s7  }
  0x15   : > { %124 = sbr.rel (%p121_p12) target bundleno = 80 (0x50), region = 24  ;;  %s362_s30 = sshll.u32 (!%p121_p12), %s126_s29, 3 }
  0x16   : > { %s127_s2 = scalar_lea.sflag (!%p121_p12), [#allocation3], %s126_s29  ;;  %s130_s3 = scalar_lea.vmem (!%p121_p12), [#allocation2], %s362_s30 }
  0x1a   : > { %482 = dma.done.wait (%p562_p7), %s127_s2, 128  }
  0x1b   : > { %484 = vsyncadd (%p562_p7), %s127_s2, 4294967168  ;;  %v165_v0 = vld [vmem:[%s130_s3] sm:$0xff]  ;;  %p156_p13 = scmp.lt.s32.totalorder %s499_s9, 1  ;;  %v252_v42 = vlaneseq }
  0x1c   : > { %425 = vrcp.f32 %v165_v0  ;;  %v177_v3 = vand.u32 2147483648, %v165_v0  ;;  %vm171_vm0 = vweird.f32 %v165_v0  ;;  %v175_v5 = vand.u32 2147483647, %v165_v0 }
  0x1d   : > { %s630_s9 = smov (!%p156_p13, %s499_s9), 1  ;;  %v182_v11 = vperm.slane %v165_v0, 0  ;;  %v183_v12 = vperm.slane %v165_v0, 4  ;;  %v198_v19 = vperm.slane %v165_v0, 1  ;;  %v199_v20 = vperm.slane %v165_v0, 5 }
  0x1e   : > { %v178_v7 = vor.u32 1.1754944e-38, %v177_v3  ;;  %vm176_vm3 = vcmp.eq.f32.partialorder %v175_v5, 8.507059e+37  ;;  %s369_s4 = sshll.u32 %s630_s9, 5  ;;  %v221_v29 = vperm.slane %v165_v0, 2  ;;  %v222_v30 = vperm.slane %v165_v0, 6 }
  0x1f   : > { %v186_v13 = vperm.slane %v182_v11, 0  ;;  %v187_v14 = vperm.slane %v183_v12, 0  ;;  %s589_s12 = scalar_lea.vmem %s619_s1, %s369_s4  ;;  %v202_v21 = vperm.slane %v198_v19, 1  ;;  %v203_v22 = vperm.slane %v199_v20, 1 }
  0x20   : > { %v225_v34 = vperm.slane %v221_v29, 2  ;;  %v226_v36 = vperm.slane %v222_v30, 2  ;;  %vm254_vm4 = vcmp.lt.s32.totalorder %v252_v42, 256 }
  0x22   : > { %v426_v1 = vpop.eup %425 }
  0x23   : > { %v167_v2 = vmul.f32 %v426_v1, %v165_v0  ;;  %vm172_vm1 = vweird.f32 %v426_v1 }
  0x24   : > { %vm173_vm2 = vmor %vm171_vm0, %vm172_vm1 }
  0x25   : > { %v168_v4 = vsub.f32 1.0, %v167_v2 }
  0x27   : > { %v169_v6 = vmul.f32 %v426_v1, %v168_v4 }
  0x29   : > { %v170_v8 = vadd.f32 %v426_v1, %v169_v6 }
  0x2b   : > { %v174_v9 = vsel %vm173_vm2, %v426_v1, %v170_v8 }
  0x2c   : > { %v179_v10 = vsel %vm176_vm3, %v178_v7, %v174_v9 }
  0x2d   : > { %189 = vst [vmem:[#allocation1] ss:$2 sm:$0xff] %v179_v10  ;;  %v246_v31 = vmul.f32 %v179_v10, %v165_v0 }
  0x34   : > { %v190_v15 = vld.sshfl [vmem:[#allocation1] sm:$0xff pattern:$0x75316420]  ;;  %v191_v16 = vld.sshfl [vmem:[#allocation1 + $0x8] sm:$0xff pattern:$0x75316420] }
  0x35   : > { %204 = vst [vmem:[#allocation1] ss:$2 sm:$0xff] %v179_v10  ;;  %v194_v17 = vmul.f32 %v190_v15, %v186_v13  ;;  %v195_v18 = vmul.f32 %v191_v16, %v187_v14 }
  0x37   : > { %196 = vst [vmem:[%s589_s12] sm:$0xf] %v194_v17 }
  0x38   : > { %197 = vst [vmem:[%s589_s12 + $0x8] sm:$0xf] %v195_v18 }
  0x3c   : > { %v205_v23 = vld.sshfl [vmem:[#allocation1] sm:$0xff pattern:$0x75316420]  ;;  %v206_v24 = vld.sshfl [vmem:[#allocation1 + $0x8] sm:$0xff pattern:$0x75316420] }
  0x3d   : > { %227 = vst [vmem:[#allocation1] ss:$2 sm:$0xff] %v179_v10  ;;  %v207_v25 = vrot.slane %v205_v23, 1  ;;  %v208_v26 = vrot.slane %v206_v24, 1 }
  0x3f   : > { %v211_v27 = vmul.f32 %v207_v25, %v202_v21  ;;  %v212_v28 = vmul.f32 %v208_v26, %v203_v22 }
  0x41   : > { %v215_v32 = vrot.slane %v211_v27, 4  ;;  %v216_v33 = vrot.slane %v212_v28, 4 }
  0x43   : > { %219 = vst [vmem:[%s589_s12] sm:$0x70] %v215_v32 }
  0x44   : > { %220 = vst [vmem:[%s589_s12 + $0x8] sm:$0x70] %v216_v33  ;;  %v228_v35 = vld.sshfl [vmem:[#allocation1] sm:$0xff pattern:$0x75316420] }
  0x45   : > { %248 = vst [vmem:[#allocation1] sm:$0xff] %v246_v31  ;;  %v230_v37 = vrot.slane %v228_v35, 2  ;;  %v229_v38 = vld.sshfl [vmem:[#allocation1 + $0x8] sm:$0xff pattern:$0x75316420] }
  0x46   : > { %v231_v39 = vrot.slane %v229_v38, 2 }
  0x47   : > { %v234_v40 = vmul.f32 %v230_v37, %v225_v34 }
  0x48   : > { %v235_v41 = vmul.f32 %v231_v39, %v226_v36 }
  0x49   : > { %v238_v43 = vrot.slane %v234_v40, 1 }
  0x4a   : > { %v239_v44 = vrot.slane %v235_v41, 1 }
  0x4b   : > { %242 = vst [vmem:[%s589_s12] sm:$0x80] %v238_v43 }
  0x4c   : > { %244 = vst [vmem:[%s589_s12 + $0x10] sm:$0x1] %v238_v43  ;;  %v250_v45 = vld [vmem:[#allocation1 + $0x3] ss:$4 sm:$0xff] }
  0x4d   : > { %243 = vst [vmem:[%s589_s12 + $0x8] sm:$0x80] %v239_v44 }
  0x4e   : > { %245 = vst [vmem:[%s589_s12 + $0x18] sm:$0x1] %v239_v44 }
  0x4f   : > { %365 = vst.msk [vmem:[%s589_s12 + $0x11] ss:$8 sm:$0x3] %vm254_vm4, %v250_v45 }
  0x50 PF: > { %s14_s11 = sadd.s32 1, %s507_s11   ;;  %s622_s6 = smov %s491_s7 }
  0x51   : > { %p11_p0 = scmp.ge.s32.totalorder %s14_s11, 4   ;;  %s623_s7 = smov %s495_s8 }
  0x52   : > { %s624_s8 = smov %s568_s18  ;;  %s625_s9 = smov %s503_s10 }
  0x53   : > { %s626_s10 = smov %s628_s13  ;;  %13 = sbr.rel (!%p11_p0) target bundleno = 4 (0x4), region = 66 }
  0x58   :  { %289 = vsyncpa [#allocation3], 1 }
  0x59   :  { %291 = vsyncpa [#allocation3 + $0x1], 1 }

</bundles_post_ra>
